<compile_context>
chip_gen: v5e
topology: v5e:2x2
jax: 0.10.0
libtpu: 0.0.40
codegen_flags: <defaults>
</compile_context>

<pallas_src>
import jax
import jax.numpy as jnp
from jax.experimental import pallas as pl
from jax.experimental.pallas import tpu as pltpu  # noqa: F401  (TPU backend)


def _prompt_kernel(evid_ref, w_ref, b_ref, pe_ref, text_ref, out_ref):
    """Single invocation; all operands are full arrays resident in VMEM.

    evid_ref : (B, H)         evidence embedding
    w_ref    : (H, 2H)        fused [W0^T | W1^T]
    b_ref    : (1, 2H)        fused [b0 | b1]
    pe_ref   : (L, P, H)      prompt embeddings for all labels
    text_ref : (B, S, H)      token embeddings of the input sequence
    out_ref  : (L, B, S+P, H) per-label prompted sequence
    """
    L, P, H = pe_ref.shape
    B, S, _ = text_ref.shape

    # One fused matmul for both linear layers (single MXU pass over (H, 2H)).
    h = jnp.dot(evid_ref[...], w_ref[...],
                preferred_element_type=jnp.float32) + b_ref[...]      # (B, 2H)
    g = jnp.tanh(h / 100.0)                                           # (B, 2H)
    scal_p1 = g[:, :H] + 1.0          # scaling + 1, computed once    # (B, H)
    shift = g[:, H:]                  # shifting                      # (B, H)

    # modulated[l, b, p, h] = pe[l, p, h] * (scaling[b, h] + 1) + shifting[b, h]
    modulated = (pe_ref[...][:, None, :, :] * scal_p1[None, :, None, :]
                 + shift[None, :, None, :])                           # (L,B,P,H)

    # Final sequence per label: [CLS token | modulated prompts | rest of text].
    cls_tok = text_ref[:, 0:1, :]                                     # (B,1,H)
    rest = text_ref[:, 1:, :]                                         # (B,S-1,H)
    out_ref[:, :, 0:1, :] = jnp.broadcast_to(cls_tok[None], (L, B, 1, H))
    out_ref[:, :, 1:1 + P, :] = modulated
    out_ref[:, :, 1 + P:, :] = jnp.broadcast_to(rest[None], (L, B, S - 1, H))


def prompt_learner_forward(input_ids, token_emb_table, evid_emb,
                           prompt_embs, w0, b0, w1, b1):
    """Reproduces PromptLearner.forward.

    input_ids       : [B, S] int32
    token_emb_table : [V, H] float32
    evid_emb        : [B, H] float32
    prompt_embs     : [L, P, H] float32
    w0, w1          : [H, H] float32 (PyTorch Linear layout: [out, in])
    b0, b1          : [H]    float32

    Returns a single stacked array out of shape [L, B, 1 + P + (S-1), H];
    out[l] corresponds to prompts_list[l] of the PyTorch module.
    """
    B, S = input_ids.shape
    L, P, H = prompt_embs.shape

    # Glue: embedding gather (same as token_embs(input_ids)).
    inputs_embeds = jnp.take(token_emb_table, input_ids, axis=0)      # (B, S, H)

    # Fuse the two linear layers into one (H, 2H) matmul.
    w_cat = jnp.concatenate([jnp.transpose(w0), jnp.transpose(w1)], axis=1)
    b_cat = jnp.concatenate([b0, b1]).reshape(1, 2 * H)

    out = pl.pallas_call(
        _prompt_kernel,
        out_shape=jax.ShapeDtypeStruct((L, B, S + P, H), jnp.float32),
    )(evid_emb, w_cat, b_cat, prompt_embs, inputs_embeds)
    return out


def _reference_forward(input_ids, token_emb_table, evid_emb,
                       prompt_embs, w0, b0, w1, b1):
    """Pure-JAX reference mirroring the PyTorch code (returns list of L)."""
    inputs_embeds = jnp.take(token_emb_table, input_ids, axis=0)
    scaling = jnp.tanh((evid_emb @ w0.T + b0) / 100.0)
    shifting = jnp.tanh((evid_emb @ w1.T + b1) / 100.0)
    L, P, H = prompt_embs.shape
    B = evid_emb.shape[0]
    scaling = jnp.broadcast_to(scaling[:, None, :], (B, P, H))
    shifting = jnp.broadcast_to(shifting[:, None, :], (B, P, H))
    outs = []
    for l in range(L):
        pe = jnp.broadcast_to(prompt_embs[l][None], (B, P, H))
        pe = pe * (scaling + 1.0) + shifting
        outs.append(jnp.concatenate(
            [inputs_embeds[:, :1, :], pe, inputs_embeds[:, 1:, :]], axis=1))
    return outs


if __name__ == "__main__":
    # Small deterministic config.
    B, S, H = 4, 8, 128        # batch, seq len, hidden size
    V = 64                     # vocab size
    L = 3                      # num_labels
    P = 8                      # num_prompt_embs

    key = jax.random.PRNGKey(0)
    k1, k2, k3, k4, k5, k6, k7, k8 = jax.random.split(key, 8)

    input_ids = jax.random.randint(k1, (B, S), 0, V, dtype=jnp.int32)
    token_emb_table = jax.random.normal(k2, (V, H), dtype=jnp.float32) * 0.02
    evid_emb = jax.random.normal(k3, (B, H), dtype=jnp.float32)
    # "random_prompt_init": prompt_embs = token_embs[random token ids]
    prompt_token_ids = jax.random.randint(k4, (L, P), 0, V, dtype=jnp.int32)
    prompt_embs = jnp.take(token_emb_table, prompt_token_ids, axis=0)  # [L,P,H]
    # Linear layers (PyTorch layout: weight [out, in], bias [out]).
    w0 = jax.random.normal(k5, (H, H), dtype=jnp.float32) * 0.05
    b0 = jax.random.normal(k6, (H,), dtype=jnp.float32) * 0.05
    w1 = jax.random.normal(k7, (H, H), dtype=jnp.float32) * 0.05
    b1 = jax.random.normal(k8, (H,), dtype=jnp.float32) * 0.05

    out = prompt_learner_forward(input_ids, token_emb_table, evid_emb,
                                 prompt_embs, w0, b0, w1, b1)
    out = jax.block_until_ready(out)

    ref_list = _reference_forward(input_ids, token_emb_table, evid_emb,
                                  prompt_embs, w0, b0, w1, b1)

    assert out.shape == (L, B, 1 + P + (S - 1), H), out.shape
    for l in range(L):
        assert jnp.allclose(out[l], ref_list[l], atol=1e-5, rtol=1e-5), l

    print("KERNEL_OK")
</pallas_src>

<mosaic_0001>
module attributes {stable_mosaic.version = 11 : i64} {
  func.func @_prompt_kernel(%arg0: memref<4x128xf32, #tpu.memory_space<vmem>>, %arg1: memref<128x256xf32, #tpu.memory_space<vmem>>, %arg2: memref<1x256xf32, #tpu.memory_space<vmem>>, %arg3: memref<3x8x128xf32, #tpu.memory_space<vmem>>, %arg4: memref<4x8x128xf32, #tpu.memory_space<vmem>>, %arg5: memref<3x4x16x128xf32, #tpu.memory_space<vmem>>) attributes {dimension_semantics = [], scalar_prefetch = 0 : i64, scratch_operands = 0 : i64, tpu.core_type = #tpu.core_type<tc>} {
    %c0 = arith.constant 0 : index
    %c0_0 = arith.constant 0 : index
    %0 = vector.load %arg0[%c0, %c0_0] : memref<4x128xf32, #tpu.memory_space<vmem>>, vector<4x128xf32>
    %c0_1 = arith.constant 0 : index
    %c0_2 = arith.constant 0 : index
    %1 = vector.load %arg1[%c0_1, %c0_2] : memref<128x256xf32, #tpu.memory_space<vmem>>, vector<128x256xf32>
    %cst = arith.constant dense<0.000000e+00> : vector<4x256xf32>
    %2 = tpu.matmul %0, %1, %cst {dimension_numbers = #tpu.dot_dimension_numbers<[1], [0], [0], [1], [0, 0, 1, 1], [], []>} : vector<4x128xf32>, vector<128x256xf32>, vector<4x256xf32> -> vector<4x256xf32>
    %c0_3 = arith.constant 0 : index
    %c0_4 = arith.constant 0 : index
    %3 = vector.load %arg2[%c0_3, %c0_4] : memref<1x256xf32, #tpu.memory_space<vmem>>, vector<1x256xf32>
    %4 = vector.broadcast %3 : vector<1x256xf32> to vector<4x256xf32>
    %5 = arith.addf %2, %4 : vector<4x256xf32>
    %cst_5 = arith.constant 1.000000e+02 : f32
    %6 = vector.broadcast %cst_5 : f32 to vector<4x256xf32>
    %7 = arith.divf %5, %6 : vector<4x256xf32>
    %8 = math.tanh %7 : vector<4x256xf32>
    %9 = vector.extract_strided_slice %8 {offsets = [0, 0], sizes = [4, 128], strides = [1, 1]} : vector<4x256xf32> to vector<4x128xf32>
    %cst_6 = arith.constant 1.000000e+00 : f32
    %10 = vector.broadcast %cst_6 : f32 to vector<4x128xf32>
    %11 = arith.addf %9, %10 : vector<4x128xf32>
    %12 = vector.extract_strided_slice %8 {offsets = [0, 128], sizes = [4, 128], strides = [1, 1]} : vector<4x256xf32> to vector<4x128xf32>
    %c0_7 = arith.constant 0 : index
    %c0_8 = arith.constant 0 : index
    %c0_9 = arith.constant 0 : index
    %13 = vector.load %arg3[%c0_7, %c0_8, %c0_9] : memref<3x8x128xf32, #tpu.memory_space<vmem>>, vector<3x8x128xf32>
    %14 = vector.shape_cast %13 : vector<3x8x128xf32> to vector<3x1x8x128xf32>
    %15 = vector.shape_cast %11 : vector<4x128xf32> to vector<1x4x1x128xf32>
    %16 = vector.broadcast %14 : vector<3x1x8x128xf32> to vector<3x4x8x128xf32>
    %17 = vector.broadcast %15 : vector<1x4x1x128xf32> to vector<3x4x8x128xf32>
    %18 = arith.mulf %16, %17 : vector<3x4x8x128xf32>
    %19 = vector.shape_cast %12 : vector<4x128xf32> to vector<1x4x1x128xf32>
    %20 = vector.broadcast %19 : vector<1x4x1x128xf32> to vector<3x4x8x128xf32>
    %21 = arith.addf %18, %20 : vector<3x4x8x128xf32>
    %c0_10 = arith.constant 0 : index
    %c0_11 = arith.constant 0 : index
    %c0_12 = arith.constant 0 : index
    %22 = vector.load %arg4[%c0_10, %c0_11, %c0_12] : memref<4x8x128xf32, #tpu.memory_space<vmem>>, vector<4x1x128xf32>
    %c0_13 = arith.constant 0 : index
    %c1 = arith.constant 1 : index
    %c0_14 = arith.constant 0 : index
    %23 = vector.load %arg4[%c0_13, %c1, %c0_14] : memref<4x8x128xf32, #tpu.memory_space<vmem>>, vector<4x7x128xf32>
    %24 = vector.shape_cast %22 : vector<4x1x128xf32> to vector<1x4x1x128xf32>
    %25 = vector.shape_cast %24 : vector<1x4x1x128xf32> to vector<1x4x1x128xf32>
    %26 = vector.broadcast %25 : vector<1x4x1x128xf32> to vector<3x4x1x128xf32>
    %c0_15 = arith.constant 0 : index
    %c0_16 = arith.constant 0 : index
    %c0_17 = arith.constant 0 : index
    %c0_18 = arith.constant 0 : index
    %27 = vector.load %arg5[%c0_15, %c0_16, %c0_17, %c0_18] : memref<3x4x16x128xf32, #tpu.memory_space<vmem>>, vector<3x4x1x128xf32>
    tpu.vector_store %arg5[%c0_15, %c0_16, %c0_17, %c0_18], %26 {strides = array<i32>} : memref<3x4x16x128xf32, #tpu.memory_space<vmem>>, vector<3x4x1x128xf32>,
    %c0_19 = arith.constant 0 : index
    %c0_20 = arith.constant 0 : index
    %c1_21 = arith.constant 1 : index
    %c0_22 = arith.constant 0 : index
    %28 = vector.load %arg5[%c0_19, %c0_20, %c1_21, %c0_22] : memref<3x4x16x128xf32, #tpu.memory_space<vmem>>, vector<3x4x8x128xf32>
    tpu.vector_store %arg5[%c0_19, %c0_20, %c1_21, %c0_22], %21 {strides = array<i32>} : memref<3x4x16x128xf32, #tpu.memory_space<vmem>>, vector<3x4x8x128xf32>,
    %29 = vector.shape_cast %23 : vector<4x7x128xf32> to vector<1x4x7x128xf32>
    %30 = vector.shape_cast %29 : vector<1x4x7x128xf32> to vector<1x4x7x128xf32>
    %31 = vector.broadcast %30 : vector<1x4x7x128xf32> to vector<3x4x7x128xf32>
    %c0_23 = arith.constant 0 : index
    %c0_24 = arith.constant 0 : index
    %c9 = arith.constant 9 : index
    %c0_25 = arith.constant 0 : index
    %32 = vector.load %arg5[%c0_23, %c0_24, %c9, %c0_25] : memref<3x4x16x128xf32, #tpu.memory_space<vmem>>, vector<3x4x7x128xf32>
    tpu.vector_store %arg5[%c0_23, %c0_24, %c9, %c0_25], %31 {strides = array<i32>} : memref<3x4x16x128xf32, #tpu.memory_space<vmem>>, vector<3x4x7x128xf32>,
    return
  }
}

</mosaic_0001>

<bundles_post_ra>
// kernel: tpu_custom_call.1
= control target key start
LH: loop header
LB: loop body
LE: loop exit
PB: predicated region body
PF: predicated region fallthrough
CT: control target
= control target key end

     0   :  { %10 = vsyncpa [#allocation3], 0  ;;  %s559_s0 = inlined_call_operand.hbm [shape: f32[4,128], index: 0, kind: input, shape index: {}]   ;;  %s560_s1 = inlined_call_operand.hbm [shape: f32[128,256], index: 1, kind: input, shape index: {}]   ;;  %s561_s2 = inlined_call_operand.hbm [shape: f32[1,256], index: 2, kind: input, shape index: {}]   ;;  %s562_s3 = inlined_call_operand.hbm [shape: f32[3,8,128], index: 3, kind: input, shape index: {}]   ;;  %s563_s4 = inlined_call_operand.hbm [shape: f32[4,8,128], index: 4, kind: input, shape index: {}]   ;;  %s564_s5 = inlined_call_operand.hbm [shape: f32[3,4,16,128], index: 5, kind: output, shape index: {}]  }
   0x1   :  { %11 = vsyncpa [#allocation6], 0 }
   0x2   :  { %12 = vsyncpa [#allocation9], 0  ;;  %s29_s20 = sshll.u32 %s560_s1, 4  ;;  %s30_s20 = int_to_ptr.hbm [resolvable:$true] %s29_s20 }
   0x3   :  { %13 = vsyncpa [#allocation4], 0  ;;  %s471_s21 = smov [#allocation5]   ;;  %s53_s25 = sshll.u32 %s562_s3, 4  ;;  %s54_s25 = int_to_ptr.hbm [resolvable:$true] %s53_s25 }
   0x4   :  { %s31_s22 = sshll.u32 %s471_s21, 4  ;;  %s472_s26 = smov 256   ;;  %s32_s22 = int_to_ptr.vmem [resolvable:$true] %s31_s22 }
   0x5   :  { %s473_s27 = smov 16   ;;  %s474_s28 = smov [#allocation8]  }
   0x6   :  { %37 = dma.hbm_to_vmem [thread:$0]  %s30_s20, 4096, %s32_s22, [#allocation6], %s472_s26, %s472_s26, %s473_s27  }
   0x7   :  { %s55_s29 = sshll.u32 %s474_s28, 4  ;;  %s475_s30 = smov 128   ;;  %s56_s29 = int_to_ptr.vmem [resolvable:$true] %s55_s29 }
   0x8   :  { %s476_s6 = smov 8   ;;  %s19_s8 = sshll.u32 %s559_s0, 4  ;;  %s20_s8 = int_to_ptr.hbm [resolvable:$true] %s19_s8 }
   0x9   :  { %61 = dma.hbm_to_vmem [thread:$0]  %s54_s25, 384, %s56_s29, [#allocation9], %s475_s30, %s475_s30, %s476_s6  }
   0xa   :  { %s477_s9 = smov [#allocation2]   ;;  %s43_s12 = sshll.u32 %s561_s2, 4  ;;  %s44_s12 = int_to_ptr.hbm [resolvable:$true] %s43_s12 }
   0xb   :  { %s21_s3 = sshll.u32 %s477_s9, 4  ;;  %s478_s13 = smov [#allocation7]   ;;  %s22_s3 = int_to_ptr.vmem [resolvable:$true] %s21_s3 }
   0xc   :  { %24 = dma.hbm_to_vmem [thread:$0]  %s20_s8, 64, %s22_s3, [#allocation3]  }
   0xd   :  { %s45_s14 = sshll.u32 %s478_s13, 4  ;;  %s66_s17 = sshll.u32 %s563_s4, 4  ;;  %s46_s14 = int_to_ptr.vmem [resolvable:$true] %s45_s14  ;;  %s67_s17 = int_to_ptr.hbm [resolvable:$true] %s66_s17 }
   0xe   :  { %48 = dma.hbm_to_vmem [thread:$0]  %s44_s12, 32, %s46_s14, [#allocation6]  }
   0xf   :  { %s479_s0 = smov [#allocation10]  }
  0x10   :  { %s68_s18 = sshll.u32 %s479_s0, 4  ;;  %s69_s18 = int_to_ptr.vmem [resolvable:$true] %s68_s18 }
  0x11   :  { %74 = dma.hbm_to_vmem [thread:$0]  %s67_s17, 512, %s69_s18, [#allocation9], %s475_s30, %s475_s30, %s476_s6  }
  0x12   :  { %463 = dma.done.wait [#allocation3], 64  }
  0x13   :  { %464 = vsyncadd [#allocation3], 4294967232 }
  0x14   :  { %465 = dma.done.wait [#allocation6], 4128  }
  0x15   :  { %466 = vsyncadd [#allocation6], 4294963168 }
  0x16   :  { %467 = dma.done.wait [#allocation9], 896  }
  0x17   :  { %468 = vsyncadd [#allocation9], 4294966400  ;;  %v126_v0 = vld [vmem:[#allocation5 + $0xf0] sm:$0xff]  ;;  %v124_v1 = vld [vmem:[#allocation5 + $0xe0] sm:$0xff]  ;;  %v480_v33 = vmov 100.0   ;;  %s481_s2 = smov [#allocation11]  }
  0x18   :  { %134 = vmatpush.msra.mxu0 %v126_v0  ;;  %v127_v2 = vld [vmem:[#allocation5 + $0xf8] sm:$0xff]  ;;  %v125_v3 = vld [vmem:[#allocation5 + $0xe8] sm:$0xff]  ;;  %v122_v4 = vld [vmem:[#allocation5 + $0xd0] sm:$0xff]  ;;  %313 = vrcp.f32 %v480_v33  ;;  %s285_s4 = sshll.u32 %s481_s2, 4  ;;  %s287_s21 = sshll.u32 %s564_s5, 4  ;;  %s286_s4 = int_to_ptr.vmem [resolvable:$true] %s285_s4  ;;  %s288_s21 = int_to_ptr.hbm [resolvable:$true] %s287_s21 }
  0x19   :  { %154 = vmatpush.msra.mxu1 %v127_v2  ;;  %v123_v5 = vld [vmem:[#allocation5 + $0xd8] sm:$0xff]  ;;  %v120_v6 = vld [vmem:[#allocation5 + $0xc0] sm:$0xff]  ;;  %v121_v7 = vld [vmem:[#allocation5 + $0xc8] sm:$0xff] }
  0x1a   :  { %135 = vmatpush.msra.mxu0 %v124_v1  ;;  %v118_v8 = vld [vmem:[#allocation5 + $0xb0] sm:$0xff]  ;;  %v119_v9 = vld [vmem:[#allocation5 + $0xb8] sm:$0xff]  ;;  %v116_v10 = vld [vmem:[#allocation5 + $0xa0] sm:$0xff] }
  0x1b   :  { %155 = vmatpush.msra.mxu1 %v125_v3  ;;  %v117_v11 = vld [vmem:[#allocation5 + $0xa8] sm:$0xff]  ;;  %v114_v12 = vld [vmem:[#allocation5 + $0x90] sm:$0xff]  ;;  %v115_v13 = vld [vmem:[#allocation5 + $0x98] sm:$0xff] }
  0x1c   :  { %136 = vmatpush.msra.mxu0 %v122_v4  ;;  %v112_v14 = vld [vmem:[#allocation5 + $0x80] sm:$0xff]  ;;  %v113_v15 = vld [vmem:[#allocation5 + $0x88] sm:$0xff]  ;;  %v110_v16 = vld [vmem:[#allocation5 + $0x70] sm:$0xff] }
  0x1d   :  { %156 = vmatpush.msra.mxu1 %v123_v5  ;;  %v111_v17 = vld [vmem:[#allocation5 + $0x78] sm:$0xff]  ;;  %v108_v18 = vld [vmem:[#allocation5 + $0x60] sm:$0xff]  ;;  %v109_v19 = vld [vmem:[#allocation5 + $0x68] sm:$0xff] }
  0x1e   :  { %137 = vmatpush.msra.mxu0 %v120_v6  ;;  %v106_v20 = vld [vmem:[#allocation5 + $0x50] sm:$0xff]  ;;  %v107_v21 = vld [vmem:[#allocation5 + $0x58] sm:$0xff]  ;;  %v104_v22 = vld [vmem:[#allocation5 + $0x40] sm:$0xff]  ;;  %v314_v34 = vpop.eup %313 }
  0x1f   :  { %157 = vmatpush.msra.mxu1 %v121_v7  ;;  %v105_v23 = vld [vmem:[#allocation5 + $0x48] sm:$0xff]  ;;  %v102_v24 = vld [vmem:[#allocation5 + $0x30] sm:$0xff]  ;;  %v103_v25 = vld [vmem:[#allocation5 + $0x38] sm:$0xff]  ;;  %v175_v35 = vmul.f32 100.0, %v314_v34  ;;  %vm179_vm0 = vweird.f32 %v314_v34 }
  0x20   :  { %138 = vmatpush.msra.mxu0 %v118_v8  ;;  %v100_v26 = vld [vmem:[#allocation5 + $0x20] sm:$0xff]  ;;  %v101_v27 = vld [vmem:[#allocation5 + $0x28] sm:$0xff]  ;;  %v98_v28 = vld [vmem:[#allocation5 + $0x10] sm:$0xff] }
  0x21   :  { %158 = vmatpush.msra.mxu1 %v119_v9  ;;  %v99_v29 = vld [vmem:[#allocation5 + $0x18] sm:$0xff]  ;;  %v96_v30 = vld [vmem:[#allocation5] sm:$0xff]  ;;  %v97_v32 = vld [vmem:[#allocation5 + $0x8] sm:$0xff]  ;;  %v176_v36 = vsub.f32 1.0, %v175_v35 }
  0x22   :  { %139 = vmatpush.msra.mxu0 %v116_v10  ;;  %v95_v31 = vld [vmem:[#allocation2] sm:$0xf]  ;;  %v128_v38 = vld [vmem:[#allocation7] sm:$0x3]  ;;  %v237_v44 = vld [vmem:[#allocation10] sm:$0x1] }
  0x23   :  { %159 = vmatpush.msra.mxu1 %v117_v11  ;;  %v177_v37 = vmul.f32 %v314_v34, %v176_v36  ;;  %v130_v40 = vperm.slane %v128_v38, 0  ;;  %v131_v41 = vperm.slane %v128_v38, 1  ;;  %v238_v45 = vld [vmem:[#allocation10 + $0x8] sm:$0x1]  ;;  %v239_v48 = vld [vmem:[#allocation10 + $0x10] sm:$0x1] }
  0x24   :  { %140 = vmatpush.msra.mxu0 %v114_v12  ;;  %v240_v50 = vld [vmem:[#allocation10 + $0x18] sm:$0x1]  ;;  %245 = vst [vmem:[#allocation11] sm:$0x1] %v237_v44  ;;  %v533_v53 = vld [vmem:[#allocation10 + $0x1] sm:$0x7f] }
  0x25   :  { %160 = vmatpush.msra.mxu1 %v115_v13  ;;  %v178_v39 = vadd.f32 %v314_v34, %v177_v37  ;;  %246 = vst [vmem:[#allocation11 + $0x10] sm:$0x1] %v238_v45  ;;  %v535_v55 = vld [vmem:[#allocation10 + $0x9] sm:$0x7f]  ;;  %v537_v56 = vld [vmem:[#allocation10 + $0x11] sm:$0x7f] }
  0x26   :  { %141 = vmatpush.msra.mxu0 %v112_v14  ;;  %247 = vst [vmem:[#allocation11 + $0x20] sm:$0x1] %v239_v48  ;;  %v539_v59 = vld [vmem:[#allocation10 + $0x19] sm:$0x7f]  ;;  %v186_v60 = vld [vmem:[#allocation8] sm:$0xff]  ;;  %v187_v4 = vld [vmem:[#allocation8 + $0x8] sm:$0xff] }
  0x27   :  { %161 = vmatpush.msra.mxu1 %v113_v15  ;;  %v180_v43 = vsel %vm179_vm0, %v314_v34, %v178_v39  ;;  %248 = vst [vmem:[#allocation11 + $0x30] sm:$0x1] %v240_v50 }
  0x28   :  { %142 = vmatpush.msra.mxu0 %v110_v16  ;;  %249 = vst [vmem:[#allocation11 + $0x40] sm:$0x1] %v237_v44 }
  0x29   :  { %162 = vmatpush.msra.mxu1 %v111_v17  ;;  %250 = vst [vmem:[#allocation11 + $0x50] sm:$0x1] %v238_v45  ;;  %v188_v17 = vld [vmem:[#allocation8 + $0x10] sm:$0xff] }
  0x2a   :  { %143 = vmatpush.msra.mxu0 %v108_v18  ;;  %251 = vst [vmem:[#allocation11 + $0x60] sm:$0x1] %v239_v48 }
  0x2b   :  { %163 = vmatpush.msra.mxu1 %v109_v19  ;;  %252 = vst [vmem:[#allocation11 + $0x70] sm:$0x1] %v240_v50 }
  0x2c   :  { %144 = vmatpush.msra.mxu0 %v106_v20  ;;  %253 = vst [vmem:[#allocation11 + $0x80] sm:$0x1] %v237_v44 }
  0x2d   :  { %164 = vmatpush.msra.mxu1 %v107_v21  ;;  %254 = vst [vmem:[#allocation11 + $0x90] sm:$0x1] %v238_v45 }
  0x2e   :  { %145 = vmatpush.msra.mxu0 %v104_v22  ;;  %255 = vst [vmem:[#allocation11 + $0xa0] sm:$0x1] %v239_v48 }
  0x2f   :  { %165 = vmatpush.msra.mxu1 %v105_v23  ;;  %256 = vst [vmem:[#allocation11 + $0xb0] sm:$0x1] %v240_v50 }
  0x30   :  { %146 = vmatpush.msra.mxu0 %v102_v24  ;;  %269 = vst [vmem:[#allocation11 + $0x9] sm:$0x7f] %v533_v53 }
  0x31   :  { %166 = vmatpush.msra.mxu1 %v103_v25  ;;  %270 = vst [vmem:[#allocation11 + $0x19] sm:$0x7f] %v535_v55 }
  0x32   :  { %147 = vmatpush.msra.mxu0 %v100_v26  ;;  %271 = vst [vmem:[#allocation11 + $0x29] sm:$0x7f] %v537_v56 }
  0x33   :  { %167 = vmatpush.msra.mxu1 %v101_v27  ;;  %272 = vst [vmem:[#allocation11 + $0x39] sm:$0x7f] %v539_v59 }
  0x34   :  { %148 = vmatpush.msra.mxu0 %v98_v28  ;;  %273 = vst [vmem:[#allocation11 + $0x49] sm:$0x7f] %v533_v53 }
  0x35   :  { %168 = vmatpush.msra.mxu1 %v99_v29  ;;  %274 = vst [vmem:[#allocation11 + $0x59] sm:$0x7f] %v535_v55 }
  0x36   :  { %149 = vmatpush.msra.mxu0 %v96_v30  ;;  %275 = vst [vmem:[#allocation11 + $0x69] sm:$0x7f] %v537_v56 }
  0x37   :  { %150 = vmatmul.f32.vlgmr.msra.gmra.mxu0 %v95_v31  ;;  %169 = vmatpush.msra.mxu1 %v97_v32  ;;  %276 = vst [vmem:[#allocation11 + $0x79] sm:$0x7f] %v539_v59 }
  0x38   :  { %170 = vmatmul.f32.vlgmr.msra.gmra.mxu1 %v95_v31  ;;  %277 = vst [vmem:[#allocation11 + $0x89] sm:$0x7f] %v533_v53 }
  0x39   :  { %278 = vst [vmem:[#allocation11 + $0x99] sm:$0x7f] %v535_v55 }
  0x3a   :  { %279 = vst [vmem:[#allocation11 + $0xa9] sm:$0x7f] %v537_v56 }
  0x3b   :  { %280 = vst [vmem:[#allocation11 + $0xb9] sm:$0x7f] %v539_v59 }
  0xb4   :  { %v151_v42 = vpop.f32.mrf.mxu0 }
  0xb5   :  { %v152_v46 = vadd.f32 %v151_v42, %v130_v40  ;;  %v171_v47 = vpop.f32.mrf.mxu1 }
  0xb6   :  { %v172_v49 = vadd.f32 %v171_v47, %v131_v41 }
  0xb7   :  { %v181_v51 = vmul.f32 %v180_v43, %v152_v46 }
  0xb8   :  { %v182_v52 = vmul.f32 %v180_v43, %v172_v49 }
  0xb9   :  { %315 = vtanh.f32 %v181_v51 }
  0xba   :  { %317 = vtanh.f32 %v182_v52 }
  0xbf   :  { %v316_v54 = vpop.eup %315 }
  0xc0   :  { %v318_v57 = vpop.eup %317  ;;  %v185_v58 = vadd.f32 1.0, %v316_v54 }
  0xc1   :  { %v214_v61 = vrot.slane %v318_v57, 1  ;;  %v215_v62 = vrot.slane %v318_v57, 2  ;;  %v216_v63 = vrot.slane %v318_v57, 3  ;;  %v217_v5 = vperm.slane %v318_v57, 0 }
  0xc2   :  { %v190_v0 = vrot.slane %v185_v58, 1  ;;  %v191_v1 = vrot.slane %v185_v58, 2  ;;  %v192_v2 = vrot.slane %v185_v58, 3  ;;  %v193_v3 = vperm.slane %v185_v58, 0 }
  0xc3   :  { %v218_v6 = vperm.slane %v214_v61, 0  ;;  %v219_v7 = vperm.slane %v215_v62, 0  ;;  %v220_v12 = vperm.slane %v216_v63, 0 }
  0xc4   :  { %v194_v8 = vperm.slane %v190_v0, 0  ;;  %v195_v9 = vperm.slane %v191_v1, 0  ;;  %v196_v10 = vperm.slane %v192_v2, 0  ;;  %v201_v11 = vmul.f32 %v193_v3, %v186_v60 }
  0xc5   :  { %v205_v16 = vmul.f32 %v193_v3, %v187_v4  ;;  %v209_v25 = vmul.f32 %v193_v3, %v188_v17 }
  0xc6   :  { %v202_v13 = vmul.f32 %v194_v8, %v186_v60  ;;  %v203_v14 = vmul.f32 %v195_v9, %v186_v60  ;;  %v204_v15 = vmul.f32 %v196_v10, %v186_v60  ;;  %v206_v18 = vmul.f32 %v194_v8, %v187_v4 }
  0xc7   :  { %v207_v19 = vmul.f32 %v195_v9, %v187_v4  ;;  %v225_v20 = vadd.f32 %v217_v5, %v201_v11  ;;  %v208_v23 = vmul.f32 %v196_v10, %v187_v4  ;;  %v229_v26 = vadd.f32 %v217_v5, %v205_v16 }
  0xc8   :  { %v226_v21 = vadd.f32 %v218_v6, %v202_v13  ;;  %v227_v22 = vadd.f32 %v219_v7, %v203_v14  ;;  %v228_v24 = vadd.f32 %v220_v12, %v204_v15  ;;  %v210_v27 = vmul.f32 %v194_v8, %v188_v17 }
  0xc9   :  { %257 = vst [vmem:[#allocation11 + $0x1] sm:$0xff] %v225_v20  ;;  %v230_v28 = vadd.f32 %v218_v6, %v206_v18  ;;  %v211_v29 = vmul.f32 %v195_v9, %v188_v17  ;;  %v231_v30 = vadd.f32 %v219_v7, %v207_v19  ;;  %v212_v31 = vmul.f32 %v196_v10, %v188_v17 }
  0xca   :  { %258 = vst [vmem:[#allocation11 + $0x11] sm:$0xff] %v226_v21  ;;  %v232_v32 = vadd.f32 %v220_v12, %v208_v23  ;;  %v233_v33 = vadd.f32 %v217_v5, %v209_v25  ;;  %v234_v34 = vadd.f32 %v218_v6, %v210_v27 }
  0xcb   :  { %259 = vst [vmem:[#allocation11 + $0x21] sm:$0xff] %v227_v22  ;;  %v235_v35 = vadd.f32 %v219_v7, %v211_v29  ;;  %v236_v36 = vadd.f32 %v220_v12, %v212_v31 }
  0xcc   :  { %260 = vst [vmem:[#allocation11 + $0x31] sm:$0xff] %v228_v24 }
  0xcd   :  { %261 = vst [vmem:[#allocation11 + $0x41] sm:$0xff] %v229_v26 }
  0xce   :  { %262 = vst [vmem:[#allocation11 + $0x51] sm:$0xff] %v230_v28 }
  0xcf   :  { %263 = vst [vmem:[#allocation11 + $0x61] sm:$0xff] %v231_v30 }
  0xd0   :  { %264 = vst [vmem:[#allocation11 + $0x71] sm:$0xff] %v232_v32 }
  0xd1   :  { %265 = vst [vmem:[#allocation11 + $0x81] sm:$0xff] %v233_v33 }
  0xd2   :  { %266 = vst [vmem:[#allocation11 + $0x91] sm:$0xff] %v234_v34 }
  0xd3   :  { %267 = vst [vmem:[#allocation11 + $0xa1] sm:$0xff] %v235_v35 }
  0xd4   :  { %268 = vst [vmem:[#allocation11 + $0xb1] sm:$0xff] %v236_v36 }
  0xd5   :  { %293 = dma.vmem_to_hbm [thread:$0]  %s286_s4, 3072, %s288_s21, [#allocation4], %s475_s30, %s475_s30, %s476_s6  }
  0xd6   :  { %469 = dma.done.wait [#allocation4], 3072  }
  0xd7   :  { %470 = vsyncadd [#allocation4], 4294964224 }
  0xd8   :  { %298 = vsyncpa [#allocation3], 1 }
  0xd9   :  { %299 = vsyncpa [#allocation6], 1 }
  0xda   :  { %300 = vsyncpa [#allocation9], 1 }
  0xdb   :  { %301 = vsyncpa [#allocation4], 1 }

</bundles_post_ra>
